<compile_context>
chip_gen: v5e
topology: v5e:2x2
jax: 0.10.0
libtpu: 0.0.40
codegen_flags: <defaults>
</compile_context>

<pallas_src>
import jax
import jax.numpy as jnp
from jax.experimental import pallas as pl
from jax.experimental.pallas import tpu as pltpu

NUM_POINTS_POINT_CLOUD = 100
IN_FEATURES = NUM_POINTS_POINT_CLOUD * 2   # 200
H1 = 64
H2 = 16


def _round_up(x, m):
    return (x + m - 1) // m * m


def _cdiv(a, b):
    return -(-a // b)


def _leaky_relu(x, slope=0.2):
    return jnp.where(x > 0, x, slope * x)


def discriminator_kernel(x_ref, w1_ref, b1_ref, w2_ref, b2_ref,
                         w3r_ref, b3_ref, o_ref):
    # Layer 1: (TB, 200) @ (200, 64) on the MXU, bf16 operands, f32 accumulate.
    # The f32->bf16 cast of the x tile is done here (free under a DMA-bound
    # pipeline) instead of as a separate HBM pass on the host.
    x_bf = x_ref[...].astype(jnp.bfloat16)
    h1 = jnp.dot(x_bf, w1_ref[...],
                 preferred_element_type=jnp.float32) + b1_ref[...]
    h1 = _leaky_relu(h1)
    # Dropout(0.3): identity in eval mode.
    # TODO(synk): training-mode dropout (prng_random_bits + scale by 1/0.7).

    # Layer 2: (TB, 64) @ (64, 16), f32 (negligible FLOPs, keep v5e-safe).
    h2 = jnp.dot(h1, w2_ref[...],
                 preferred_element_type=jnp.float32) + b2_ref[...]
    h2 = _leaky_relu(h2)
    # Dropout(0.3): identity in eval mode.

    # Layer 3 as (1,16) x (TB,16)^T -> (1, TB): lane-dense output row instead
    # of a masked, lane-sparse (TB, 1) store.
    logits = jnp.einsum('ok,nk->on', w3r_ref[...], h2,
                        preferred_element_type=jnp.float32)
    z = logits + b3_ref[0, 0]
    # Sigmoid: exp + approx reciprocal both land on the EUP slot.
    o_ref[...] = pl.reciprocal(1.0 + jnp.exp(-z), approx=True)


def discriminator_forward(points, params, *, block_b=4096):
    """points: (B, 200) f32 -> (B, 1) f32 (matches the nn.Module output)."""
    w1, b1, w2, b2, w3, b3 = params
    B, F = points.shape
    assert F == IN_FEATURES
    assert block_b % 128 == 0

    # Batch tile: large enough to amortize the ~0.35 us/step pipeline overhead,
    # but capped so there are >= ~4 grid steps (keeps both v7x TCs busy).
    tb = min(block_b, _round_up(max(1, _cdiv(B, 4)), 128))
    tb = max(tb, 128)
    grid = _cdiv(B, tb)   # ragged last block: reads unspecified rows, writes masked

    # One-shot tiny host casts/reshapes (weights only; x is streamed untouched).
    w1_bf = w1.astype(jnp.bfloat16)          # (200, 64) layer-1 MXU operand
    w3r = w3.T                               # (1, 16)

    out_row = pl.pallas_call(
        discriminator_kernel,
        out_shape=jax.ShapeDtypeStruct((1, B), jnp.float32),
        grid_spec=pltpu.PrefetchScalarGridSpec(
            num_scalar_prefetch=0,
            grid=(grid,),
            in_specs=[
                pl.BlockSpec((tb, IN_FEATURES), lambda i: (i, 0)),  # x tile
                pl.BlockSpec((IN_FEATURES, H1), lambda i: (0, 0)),  # w1 (resident)
                pl.BlockSpec((1, H1), lambda i: (0, 0)),            # b1 (resident)
                pl.BlockSpec((H1, H2), lambda i: (0, 0)),           # w2 (resident)
                pl.BlockSpec((1, H2), lambda i: (0, 0)),            # b2 (resident)
                pl.BlockSpec((1, H2), lambda i: (0, 0)),            # w3^T (resident)
                pl.BlockSpec(memory_space=pltpu.MemorySpace.SMEM),  # b3 scalar
            ],
            out_specs=pl.BlockSpec((1, tb), lambda i: (0, i)),
        ),
        compiler_params=pltpu.CompilerParams(
            dimension_semantics=("parallel",),
            vmem_limit_bytes=48 * 1024 * 1024,   # headroom for big tiles on v5e
        ),
    )(points, w1_bf, b1, w2, b2, w3r, b3)

    return out_row.reshape(B, 1)


def init_params(key):
    """Deterministic init mimicking nn.Linear default (U(-1/sqrt(fan_in), +))."""
    ks = jax.random.split(key, 6)

    def lin(kw, kb, fan_in, fan_out):
        bound = 1.0 / float(fan_in) ** 0.5
        w = jax.random.uniform(kw, (fan_in, fan_out), jnp.float32, -bound, bound)
        b = jax.random.uniform(kb, (1, fan_out), jnp.float32, -bound, bound)
        return w, b

    w1, b1 = lin(ks[0], ks[1], IN_FEATURES, H1)
    w2, b2 = lin(ks[2], ks[3], H1, H2)
    w3, b3 = lin(ks[4], ks[5], H2, 1)
    return (w1, b1, w2, b2, w3, b3)


def reference_forward(points, params):
    """Pure-JAX f32 reference matching the PyTorch module (eval mode)."""
    w1, b1, w2, b2, w3, b3 = params
    h1 = _leaky_relu(points @ w1 + b1)
    h2 = _leaky_relu(h1 @ w2 + b2)
    return jax.nn.sigmoid(h2 @ w3 + b3)


if __name__ == "__main__":
    key = jax.random.PRNGKey(0)
    k_params, k_x = jax.random.split(key)

    params = init_params(k_params)

    # Small demo batch; 320 = 2*128 + 64 so the grid has 3 steps including a
    # ragged last block (exercises pipelining, masking and the parallel axis).
    B = 320
    points = jax.random.normal(k_x, (B, IN_FEATURES), jnp.float32)

    out = discriminator_forward(points, params)
    out = jax.block_until_ready(out)

    ref = reference_forward(points, params)
    assert out.shape == (B, 1), out.shape
    # Layer-1 operands are bf16 (f32 accumulate) and sigmoid uses an approx
    # EUP reciprocal -> loosened tolerance vs the full-f32 reference.
    max_err = float(jnp.max(jnp.abs(out - ref)))
    assert max_err < 2e-2, f"mismatch vs pure-JAX reference (max err {max_err})"
    print("KERNEL_OK")
</pallas_src>

<mosaic_0001>
module attributes {stable_mosaic.version = 11 : i64} {
  func.func @discriminator_kernel(%arg0: i32, %arg1: memref<128x200xf32, #tpu.memory_space<vmem>>, %arg2: memref<200x64xbf16, #tpu.memory_space<vmem>>, %arg3: memref<1x64xf32, #tpu.memory_space<vmem>>, %arg4: memref<64x16xf32, #tpu.memory_space<vmem>>, %arg5: memref<1x16xf32, #tpu.memory_space<vmem>>, %arg6: memref<1x16xf32, #tpu.memory_space<vmem>>, %arg7: memref<1x1xf32, #tpu.memory_space<smem>>, %arg8: memref<1x128xf32, #tpu.memory_space<vmem>>) attributes {dimension_semantics = [#tpu.dimension_semantics<parallel>], iteration_bounds = array<i64: 3>, scalar_prefetch = 0 : i64, scratch_operands = 0 : i64, tpu.core_type = #tpu.core_type<tc>, window_params = [{transform_indices = @transform_0, window_bounds = array<i64: 128, 200>}, {pipeline_mode = #tpu.pipeline_mode<synchronous>, transform_indices = @transform_1, window_bounds = array<i64: 200, 64>}, {pipeline_mode = #tpu.pipeline_mode<synchronous>, transform_indices = @transform_2, window_bounds = array<i64: 1, 64>}, {pipeline_mode = #tpu.pipeline_mode<synchronous>, transform_indices = @transform_3, window_bounds = array<i64: 64, 16>}, {pipeline_mode = #tpu.pipeline_mode<synchronous>, transform_indices = @transform_4, window_bounds = array<i64: 1, 16>}, {pipeline_mode = #tpu.pipeline_mode<synchronous>, transform_indices = @transform_5, window_bounds = array<i64: 1, 16>}, {transform_indices = @transform_6, window_bounds = array<i64: 1, 1>}, {transform_indices = @transform_7, window_bounds = array<i64: 1, 128>}]} {
    %c0 = arith.constant 0 : index
    %c0_0 = arith.constant 0 : index
    %0 = vector.load %arg1[%c0, %c0_0] : memref<128x200xf32, #tpu.memory_space<vmem>>, vector<128x200xf32>
    %1 = arith.truncf %0 : vector<128x200xf32> to vector<128x200xbf16>
    %c0_1 = arith.constant 0 : index
    %c0_2 = arith.constant 0 : index
    %2 = vector.load %arg2[%c0_1, %c0_2] : memref<200x64xbf16, #tpu.memory_space<vmem>>, vector<200x64xbf16>
    %cst = arith.constant dense<0.000000e+00> : vector<128x64xf32>
    %3 = tpu.matmul %1, %2, %cst {dimension_numbers = #tpu.dot_dimension_numbers<[1], [0], [0], [1], [0, 0, 1, 1], [], []>} : vector<128x200xbf16>, vector<200x64xbf16>, vector<128x64xf32> -> vector<128x64xf32>
    %c0_3 = arith.constant 0 : index
    %c0_4 = arith.constant 0 : index
    %4 = vector.load %arg3[%c0_3, %c0_4] : memref<1x64xf32, #tpu.memory_space<vmem>>, vector<1x64xf32>
    %5 = vector.broadcast %4 : vector<1x64xf32> to vector<128x64xf32>
    %6 = arith.addf %3, %5 : vector<128x64xf32>
    %cst_5 = arith.constant 0.000000e+00 : f32
    %7 = vector.broadcast %cst_5 : f32 to vector<128x64xf32>
    %8 = arith.cmpf ogt, %6, %7 : vector<128x64xf32>
    %cst_6 = arith.constant 2.000000e-01 : f32
    %9 = vector.broadcast %cst_6 : f32 to vector<128x64xf32>
    %10 = arith.mulf %9, %6 : vector<128x64xf32>
    %11 = arith.select %8, %6, %10 : vector<128x64xi1>, vector<128x64xf32>
    %c0_7 = arith.constant 0 : index
    %c0_8 = arith.constant 0 : index
    %12 = vector.load %arg4[%c0_7, %c0_8] : memref<64x16xf32, #tpu.memory_space<vmem>>, vector<64x16xf32>
    %cst_9 = arith.constant dense<0.000000e+00> : vector<128x16xf32>
    %13 = tpu.matmul %11, %12, %cst_9 {dimension_numbers = #tpu.dot_dimension_numbers<[1], [0], [0], [1], [0, 0, 1, 1], [], []>} : vector<128x64xf32>, vector<64x16xf32>, vector<128x16xf32> -> vector<128x16xf32>
    %c0_10 = arith.constant 0 : index
    %c0_11 = arith.constant 0 : index
    %14 = vector.load %arg5[%c0_10, %c0_11] : memref<1x16xf32, #tpu.memory_space<vmem>>, vector<1x16xf32>
    %15 = vector.broadcast %14 : vector<1x16xf32> to vector<128x16xf32>
    %16 = arith.addf %13, %15 : vector<128x16xf32>
    %cst_12 = arith.constant 0.000000e+00 : f32
    %17 = vector.broadcast %cst_12 : f32 to vector<128x16xf32>
    %18 = arith.cmpf ogt, %16, %17 : vector<128x16xf32>
    %cst_13 = arith.constant 2.000000e-01 : f32
    %19 = vector.broadcast %cst_13 : f32 to vector<128x16xf32>
    %20 = arith.mulf %19, %16 : vector<128x16xf32>
    %21 = arith.select %18, %16, %20 : vector<128x16xi1>, vector<128x16xf32>
    %c0_14 = arith.constant 0 : index
    %c0_15 = arith.constant 0 : index
    %22 = vector.load %arg6[%c0_14, %c0_15] : memref<1x16xf32, #tpu.memory_space<vmem>>, vector<1x16xf32>
    "tpu.trace_start"() <{level = 10 : i32, message = "ok,nk->on"}> : () -> ()
    %cst_16 = arith.constant dense<0.000000e+00> : vector<1x128xf32>
    %23 = tpu.matmul %22, %21, %cst_16 {dimension_numbers = #tpu.dot_dimension_numbers<[1], [1], [0], [0], [0, 0, 1, 0], [], []>} : vector<1x16xf32>, vector<128x16xf32>, vector<1x128xf32> -> vector<1x128xf32>
    "tpu.trace_stop"() : () -> ()
    %c0_17 = arith.constant 0 : index
    %c0_18 = arith.constant 0 : index
    %24 = memref.load %arg7[%c0_17, %c0_18] : memref<1x1xf32, #tpu.memory_space<smem>>
    %25 = vector.broadcast %24 : f32 to vector<1x128xf32>
    %26 = arith.addf %23, %25 : vector<1x128xf32>
    %cst_19 = arith.constant 0.000000e+00 : f32
    %27 = vector.broadcast %cst_19 : f32 to vector<1x128xf32>
    %28 = arith.subf %27, %26 : vector<1x128xf32>
    %29 = math.exp %28 : vector<1x128xf32>
    %cst_20 = arith.constant 1.000000e+00 : f32
    %30 = vector.broadcast %cst_20 : f32 to vector<1x128xf32>
    %31 = arith.addf %30, %29 : vector<1x128xf32>
    %32 = tpu.reciprocal %31 {approx = true} : vector<1x128xf32> -> vector<1x128xf32>
    %c0_21 = arith.constant 0 : index
    %c0_22 = arith.constant 0 : index
    %33 = vector.load %arg8[%c0_21, %c0_22] : memref<1x128xf32, #tpu.memory_space<vmem>>, vector<1x128xf32>
    tpu.vector_store %arg8[%c0_21, %c0_22], %32 {strides = array<i32>} : memref<1x128xf32, #tpu.memory_space<vmem>>, vector<1x128xf32>,
    return
  }
  func.func @transform_0(%arg0: i32) -> (i32, i32) {
    %c0_i32 = arith.constant 0 : i32
    %c0_i32_0 = arith.constant 0 : i32
    return %arg0, %c0_i32 : i32, i32
  }
  func.func @transform_1(%arg0: i32) -> (i32, i32) {
    %c0_i32 = arith.constant 0 : i32
    %c0_i32_0 = arith.constant 0 : i32
    %c0_i32_1 = arith.constant 0 : i32
    return %c0_i32, %c0_i32_0 : i32, i32
  }
  func.func @transform_2(%arg0: i32) -> (i32, i32) {
    %c0_i32 = arith.constant 0 : i32
    %c0_i32_0 = arith.constant 0 : i32
    %c0_i32_1 = arith.constant 0 : i32
    return %c0_i32, %c0_i32_0 : i32, i32
  }
  func.func @transform_3(%arg0: i32) -> (i32, i32) {
    %c0_i32 = arith.constant 0 : i32
    %c0_i32_0 = arith.constant 0 : i32
    %c0_i32_1 = arith.constant 0 : i32
    return %c0_i32, %c0_i32_0 : i32, i32
  }
  func.func @transform_4(%arg0: i32) -> (i32, i32) {
    %c0_i32 = arith.constant 0 : i32
    %c0_i32_0 = arith.constant 0 : i32
    %c0_i32_1 = arith.constant 0 : i32
    return %c0_i32, %c0_i32_0 : i32, i32
  }
  func.func @transform_5(%arg0: i32) -> (i32, i32) {
    %c0_i32 = arith.constant 0 : i32
    %c0_i32_0 = arith.constant 0 : i32
    %c0_i32_1 = arith.constant 0 : i32
    return %c0_i32, %c0_i32_0 : i32, i32
  }
  func.func @transform_6(%arg0: i32) -> (i32, i32) {
    %c0_i32 = arith.constant 0 : i32
    %c0_i32_0 = arith.constant 0 : i32
    %c0_i32_1 = arith.constant 0 : i32
    return %c0_i32, %c0_i32_0 : i32, i32
  }
  func.func @transform_7(%arg0: i32) -> (i32, i32) {
    %c0_i32 = arith.constant 0 : i32
    %c0_i32_0 = arith.constant 0 : i32
    return %c0_i32, %arg0 : i32, i32
  }
}

</mosaic_0001>

<bundles_post_ra>
// kernel: tpu_custom_call.1
= control target key start
LH: loop header
LB: loop body
LE: loop exit
PB: predicated region body
PF: predicated region fallthrough
CT: control target
= control target key end

     0   :  { %s1516_s0 = inlined_call_operand.vmem [shape: f32[320,200], index: 0, kind: input, shape index: {}]   ;;  %s1517_s1 = inlined_call_operand.vmem [shape: bf16[200,64], index: 1, kind: input, shape index: {}]   ;;  %s1518_s2 = inlined_call_operand.vmem [shape: f32[1,64], index: 2, kind: input, shape index: {}]   ;;  %s1519_s3 = inlined_call_operand.vmem [shape: f32[64,16], index: 3, kind: input, shape index: {}]   ;;  %s1520_s4 = inlined_call_operand.vmem [shape: f32[1,16], index: 4, kind: input, shape index: {}]   ;;  %s1521_s5 = inlined_call_operand.vmem [shape: f32[1,16], index: 5, kind: input, shape index: {}]   ;;  %s1522_s6 = inlined_call_operand.<no memory space> [shape: f32[1,1], index: 6, kind: input, shape index: {}]   ;;  %s1523_s7 = inlined_call_operand.hbm [shape: f32[1,320], index: 7, kind: output, shape index: {}]  }
   0x1   :  { %12 = sst [smem:[#allocation2]] %s1522_s6 }
   0x2   :  { %13 = vsyncpa [#allocation4], 0 }
   0x3   :  { %15 = vsyncpa [#allocation4 + $0x1], 0  ;;  %s1234_s26 = smov 0   ;;  %s1236_s27 = smov 0  }
   0x4   :  { %s1238_s28 = smov 0   ;;  %s1240_s29 = smov 0  }
   0x5 LB: > { %s1255_s6 = sadd.s32 4294967295, %s1189_s29   ;;  %s958_s30 = sadd.s32 4294967294, %s1189_s29   ;;  %s1189_s29 = sphi %s1240_s29, %s1529_s29   ;;  %s1185_s28 = sphi %s1238_s28, %s1528_s28   ;;  %s1181_s27 = sphi %s1236_s27, %s1527_s27   ;;  %s1177_s26 = sphi %s1234_s26, %s1526_s26  }
   0x6   : > { %s1259_s8 = sadd.s32 1, %s1189_s29   ;;  %s180_s9 = sadd.s32 1, %s1185_s28 }
   0x7   : > { %s177_s10 = ssub.s32 %s1189_s29, %s1259_s8  ;;  %p190_p0 = scmp.ne.s32.totalorder %s1185_s28, %s1181_s27 }
   0x8   : > { %p178_p1 = scmp.eq.s32.totalorder %s177_s10, 0  ;;  %p191_p2 = scmp.eq.s32.totalorder %s1255_s6, 2 }
   0x9   : > { %p196_p3 = scmp.ne.s32.totalorder %s1181_s27, %s1177_s26  ;;  %p197_p4 = scmp.eq.s32.totalorder %s958_s30, 2 }
   0xa   : > { %s1270_s11 = scalar_select %p178_p1, %s1185_s28, %s180_s9  }
   0xb   : > { %p1272_p5 = por %p191_p2, %p190_p0  ;;  %p1276_p6 = por %p197_p4, %p196_p3 }
   0xc   : > { %p961_p7 = scmp.ge.s32.totalorder %s1189_s29, 1  ;;  %p253_p8 = scmp.lt.s32.totalorder %s1189_s29, 4 }
   0xe   : > { %p254_p9 = pnand %p961_p7, %p253_p8 }
   0xf   : > { %s962_s20 = sshll.u32 (!%p254_p9), %s1255_s6, 4  ;;  %s810_s23 = sld [smem:[#allocation2]] (!%p254_p9) }
  0x10   : > { %257 = sbr.rel (%p254_p9) target bundleno = 725 (0x2d5), region = 48  ;;  %p296_p10 = scmp.lt.s32.totalorder (!%p254_p9), %s962_s20, 39 }
  0x11   : > { %s899_s30 = scalar_lea.hbm (!%p254_p9), %s1523_s7, %s1255_s6  ;;  %s1147_s6 = scalar_lea.hbm (!%p254_p9), %s1523_s7, 3 }
  0x12   : > { %s903_s14 = sshll.u32 (!%p254_p9), %s899_s30, 4  ;;  %s904_s14 = int_to_ptr.hbm [resolvable:$true] %s903_s14 }
  0x15   : > { %v1064_v0 = vld [vmem:[%s1517_s1 + $0x38] sm:$0xff]  ;;  %v1063_v1 = vld [vmem:[%s1517_s1 + $0x30] sm:$0xff]  ;;  %v380_v2 = vld [vmem:[%s1517_s1 + $0x60] sm:$0xf]  ;;  %vm485_vm0 = vcmask 1043456   ;;  %s1531_s20 = smov (!%p296_p10, %s962_s20), 39 }
  0x16   : > { %489 = vmatpush.bf16.msra.mxu0 %v1064_v0  ;;  %1069 = vmatpush.bf16.msra.mxu3 %v1064_v0  ;;  %v434_v3 = vunpack.c.l.b16 %v380_v2  ;;  %v1062_v5 = vld [vmem:[%s1517_s1 + $0x28] sm:$0xff]  ;;  %v1068_v7 = vld [vmem:[%s1517_s1 + $0x58] sm:$0xff]  ;;  %v1061_v8 = vld [vmem:[%s1517_s1 + $0x20] sm:$0xff]  ;;  %s1056_s16 = sshll.u32 %s1531_s20, 4  ;;  %vm460_vm1 = vcmask 588800   ;;  %vm647_vm3 = vcmask 523264  }
  0x17   : > { %v1067_v9 = vld [vmem:[%s1517_s1 + $0x50] sm:$0xff]  ;;  %v1060_v10 = vld [vmem:[%s1517_s1 + $0x18] sm:$0xff]  ;;  %v1066_v11 = vld [vmem:[%s1517_s1 + $0x48] sm:$0xff]  ;;  %s1316_s24 = scalar_lea.vmem %s1516_s0, %s1056_s16  ;;  %s1141_s16 = sshra.s32 %s904_s14, 4  ;;  %s1142_s16 = int_to_ptr.hbm [resolvable:$true] %s1141_s16 }
  0x18   : > { %v447_v4 = vpack.c.b16 %v434_v3, %v434_v3  ;;  %v1059_v12 = vld [vmem:[%s1517_s1 + $0x10] sm:$0xff]  ;;  %v1065_v13 = vld [vmem:[%s1517_s1 + $0x40] sm:$0xff]  ;;  %v313_v14 = vld [vmem:[%s1316_s24 + $0x28] sm:$0xff]  ;;  %s1143_s17 = scalar_lea.hbm %s1142_s16, 1  ;;  %p1148_p0 = scmp.lt.s32.totalorder %s1142_s16, %s1523_s7 }
  0x19   : > { %v315_v15 = vld [vmem:[%s1316_s24 + $0x38] sm:$0xff]  ;;  %v1058_v16 = vld [vmem:[%s1517_s1 + $0x8] sm:$0xff]  ;;  %v1057_v18 = vld [vmem:[%s1517_s1] sm:$0xff]  ;;  %p1144_p11 = scmp.ne.s32.totalorder %s1142_s16, %s1143_s17  ;;  %p1149_p1 = scmp.lt.s32.totalorder %s1147_s6, %s1143_s17 }
  0x1a   : > { %490 = vmatpush.bf16.msra.mxu0 %v1063_v1  ;;  %1070 = vmatpush.bf16.msra.mxu3 %v1063_v1  ;;  %v487_v6 = vsel %vm485_vm0, %v447_v4, 0  ;;  %v343_v17 = vpack.c.bf16 %v315_v15, %v313_v14  ;;  %v308_v19 = vld [vmem:[%s1316_s24] sm:$0xff]  ;;  %v310_v20 = vld [vmem:[%s1316_s24 + $0x10] sm:$0xff]  ;;  %v317_v22 = vld [vmem:[%s1316_s24 + $0x48] sm:$0xff] }
  0x1b   : > { %1077 = vmatpush.bf16.msra.mxu1 %v487_v6  ;;  %v340_v21 = vpack.c.bf16 %v310_v20, %v308_v19  ;;  %v319_v23 = vld [vmem:[%s1316_s24 + $0x58] sm:$0xff]  ;;  %v312_v25 = vld [vmem:[%s1316_s24 + $0x20] sm:$0xff]  ;;  %v314_v26 = vld [vmem:[%s1316_s24 + $0x30] sm:$0xff]  ;;  %p1145_p12 = pnand %p1144_p11, %p1272_p5  ;;  %p1150_p2 = por %p1149_p1, %p1148_p0 }
  0x1c   : > { %v345_v24 = vpack.c.bf16 %v319_v23, %v317_v22  ;;  %v342_v27 = vpack.c.bf16 %v314_v26, %v312_v25  ;;  %v321_v28 = vld [vmem:[%s1316_s24 + $0x68] sm:$0xff]  ;;  %v323_v29 = vld [vmem:[%s1316_s24 + $0x78] sm:$0xff]  ;;  %v316_v31 = vld [vmem:[%s1316_s24 + $0x40] sm:$0xff] }
  0x1d   : > { %v347_v30 = vpack.c.bf16 %v323_v29, %v321_v28  ;;  %v318_v32 = vld [vmem:[%s1316_s24 + $0x50] sm:$0xff]  ;;  %v324_v34 = vld [vmem:[%s1316_s24 + $0x80] sm:$0xff]  ;;  %v325_v37 = vld [vmem:[%s1316_s24 + $0x88] sm:$0xff]  ;;  %p1146_p13 = pneg %p1145_p12 }
  0x1e   : > { %491 = vmatpush.bf16.msra.mxu0 %v1062_v5  ;;  %1071 = vmatpush.bf16.msra.mxu3 %v1062_v5  ;;  %v344_v33 = vpack.c.bf16 %v318_v32, %v316_v31  ;;  %v326_v35 = vld [vmem:[%s1316_s24 + $0x90] sm:$0xff]  ;;  %v327_v38 = vld [vmem:[%s1316_s24 + $0x98] sm:$0xff]  ;;  %v320_v40 = vld [vmem:[%s1316_s24 + $0x60] sm:$0xff] }
  0x1f   : > { %1078 = vmatpush.bf16.msra.mxu1 %v1068_v7  ;;  %v348_v36 = vpack.c.bf16 %v326_v35, %v324_v34  ;;  %v349_v39 = vpack.c.bf16 %v327_v38, %v325_v37  ;;  %v322_v41 = vld [vmem:[%s1316_s24 + $0x70] sm:$0xff]  ;;  %v309_v43 = vld [vmem:[%s1316_s24 + $0x8] sm:$0xff]  ;;  %v311_v44 = vld [vmem:[%s1316_s24 + $0x18] sm:$0xff]  ;;  %p1151_p3 = pnand %p1150_p2, %p1146_p13 }
  0x20   : > { %v346_v42 = vpack.c.bf16 %v322_v41, %v320_v40  ;;  %v341_v45 = vpack.c.bf16 %v311_v44, %v309_v43  ;;  %v328_v46 = vld [vmem:[%s1316_s24 + $0xa0] sm:$0xff]  ;;  %v330_v47 = vld [vmem:[%s1316_s24 + $0xb0] sm:$0xff]  ;;  %v329_v49 = vld [vmem:[%s1316_s24 + $0xa8] sm:$0xff] }
  0x21   : > { %v350_v48 = vpack.c.bf16 %v330_v47, %v328_v46  ;;  %v331_v50 = vld [vmem:[%s1316_s24 + $0xb8] sm:$0xff]  ;;  %v332_v52 = vld [vmem:[%s1316_s24 + $0xc0] sm:$0xff]  ;;  %v334_v53 = vld [vmem:[%s1316_s24 + $0xd0] sm:$0xff] }
  0x22   : > { %492 = vmatpush.bf16.msra.mxu0 %v1061_v8  ;;  %1072 = vmatpush.bf16.msra.mxu3 %v1061_v8  ;;  %v351_v51 = vpack.c.bf16 %v331_v50, %v329_v49  ;;  %v352_v54 = vpack.c.bf16 %v334_v53, %v332_v52  ;;  %v333_v55 = vld [vmem:[%s1316_s24 + $0xc8] sm:$0xff]  ;;  %v335_v56 = vld [vmem:[%s1316_s24 + $0xd8] sm:$0xff]  ;;  %v336_v58 = vld [vmem:[%s1316_s24 + $0xe0] sm:$0xff] }
  0x23   : > { %1079 = vmatpush.bf16.msra.mxu1 %v1067_v9  ;;  %v353_v57 = vpack.c.bf16 %v335_v56, %v333_v55  ;;  %v338_v59 = vld [vmem:[%s1316_s24 + $0xf0] sm:$0xff]  ;;  %v337_v62 = vld [vmem:[%s1316_s24 + $0xe8] sm:$0xff]  ;;  %v339_v63 = vld [vmem:[%s1316_s24 + $0xf8] sm:$0xff]  ;;  %s288_s24 = sand.u32 1, %s1181_s27  }
  0x24   : > { %v354_v60 = vpack.c.bf16 %v338_v59, %v336_v58  ;;  %v355_v0 = vpack.c.bf16 %v339_v63, %v337_v62  ;;  %v642_v3 = vld [vmem:[%s1519_s3 + $0x38] sm:$0xff]  ;;  %v641_v5 = vld [vmem:[%s1519_s3 + $0x30] sm:$0xff]  ;;  %s289_s9 = scalar_lea.vmem [#allocation3], %s288_s24  ;;  %s891_s15 = scalar_lea.sflag [#allocation4], %s288_s24 }
  0x25   : > { %704 = vmatpush.msra.mxu2 %v642_v3  ;;  %v638_v8 = vld [vmem:[%s1519_s3 + $0x18] sm:$0xff]  ;;  %s901_s10 = sshll.u32 %s289_s9, 4  ;;  %s902_s10 = int_to_ptr.vmem [resolvable:$true] %s901_s10 }
  0x26   : > { %493 = vmatpush.bf16.msra.mxu0 %v1060_v10  ;;  %1073 = vmatpush.bf16.msra.mxu3 %v1060_v10  ;;  %v637_v10 = vld [vmem:[%s1519_s3 + $0x10] sm:$0xff] }
  0x27   : > { %1080 = vmatpush.bf16.msra.mxu1 %v1066_v11  ;;  %705 = vmatpush.msra.mxu2 %v641_v5 }
  0x2a   : > { %494 = vmatpush.bf16.msra.mxu0 %v1059_v12  ;;  %1074 = vmatpush.bf16.msra.mxu3 %v1059_v12  ;;  %v635_v12 = vld [vmem:[%s1519_s3] sm:$0xff] }
  0x2b   : > { %1081 = vmatpush.bf16.msra.mxu1 %v1065_v13 }
  0x2e   : > { %495 = vmatpush.bf16.msra.mxu0 %v1058_v16  ;;  %1075 = vmatpush.bf16.msra.mxu3 %v1058_v16 }
  0x2f   : > { %1014 = vmatmul.msk.bf16.vlgmr.msra.gmra.mxu1 %vm460_vm1, %v343_v17  ;;  %v1394_v17 = vld [vmem:[%s1518_s2] ss:$0 sm:$0xff] }
  0x32   : > { %496 = vmatpush.bf16.msra.mxu0 %v1057_v18  ;;  %1076 = vmatpush.bf16.msra.mxu3 %v1057_v18 }
  0x35   : > { %497 = vmatmul.bf16.vlgmr.msra.gmra.mxu0 %v340_v21  ;;  %517 = vmatmul.bf16.vlgmr.msra.gmra.mxu3 %v348_v36 }
  0x36   : > { %541 = vmatpush.bf16.msrb.mxu0 %v487_v6  ;;  %v640_v6 = vld [vmem:[%s1519_s3 + $0x28] sm:$0xff] }
  0x37   : > { %706 = vmatpush.msra.mxu2 %v640_v6 }
  0x3a   : > { %542 = vmatpush.bf16.msrb.mxu0 %v1068_v7  ;;  %v639_v7 = vld [vmem:[%s1519_s3 + $0x20] sm:$0xff] }
  0x3b   : > { %707 = vmatpush.msra.mxu2 %v639_v7 }
  0x3d   : > { %708 = vmatpush.msra.mxu2 %v638_v8 }
  0x3e   : > { %543 = vmatpush.bf16.msrb.mxu0 %v1067_v9 }
  0x3f   : > { %1015 = vmatmul.msk.bf16.gmra.mxu1 %vm460_vm1, %v345_v24  ;;  %709 = vmatpush.msra.mxu2 %v637_v10 }
  0x42   : > { %544 = vmatpush.bf16.msrb.mxu0 %v1066_v11  ;;  %v636_v11 = vld [vmem:[%s1519_s3 + $0x8] sm:$0xff] }
  0x43   : > { %710 = vmatpush.msra.mxu2 %v636_v11 }
  0x45   : > { %502 = vmatmul.bf16.gmra.mxu0 %v342_v27  ;;  %522 = vmatmul.bf16.gmra.mxu3 %v350_v48 }
  0x46   : > { %545 = vmatpush.bf16.msrb.mxu0 %v1065_v13  ;;  %711 = vmatpush.msra.mxu2 %v635_v12 }
  0x4f   : > { %1016 = vmatmul.msk.bf16.gmra.mxu1 %vm460_vm1, %v347_v30 }
  0x55   : > { %507 = vmatmul.bf16.gmra.mxu0 %v344_v33  ;;  %527 = vmatmul.bf16.gmra.mxu3 %v352_v54 }
  0x5f   : > { %1017 = vmatmul.msk.bf16.gmra.mxu1 %vm460_vm1, %v349_v39 }
  0x65   : > { %512 = vmatmul.bf16.gmra.mxu0 %v346_v42  ;;  %532 = vmatmul.bf16.gmra.mxu3 %v354_v60 }
  0x6f   : > { %1018 = vmatmul.msk.bf16.gmra.mxu1 %vm460_vm1, %v351_v51 }
  0x75   : > { %1013 = vmatmul.msk.bf16.vlgmr.msrb.gmra.mxu0 %vm460_vm1, %v341_v45 }
  0x7f   : > { %1019 = vmatmul.msk.bf16.gmra.mxu1 %vm460_vm1, %v353_v57 }
  0x8f   : > { %1020 = vmatmul.msk.bf16.gmra.mxu1 %vm460_vm1, %v355_v0 }
  0xac   : > { %v552_v15 = vpop.f32.mrf.mxu1 }
  0xb2   : > { %v498_v61 = vpop.f32.mrf.mxu0 }
  0xb3   : > { %v499_v19 = vadd.f32 %v1394_v17, %v498_v61 }
  0xb4   : > { %v554_v18 = vpop.f32.mrf.mxu1 }
  0xb8   : > { %v518_v47 = vpop.f32.mrf.mxu3 }
  0xb9   : > { %v519_v60 = vadd.f32 %v1394_v17, %v518_v47 }
  0xba   : > { %v500_v1 = vpop.f32.mrf.mxu0 }
  0xbb   : > { %v501_v25 = vadd.f32 %v1394_v17, %v500_v1 }
  0xbc   : > { %v557_v24 = vpop.f32.mrf.mxu1 }
  0xc0   : > { %v520_v55 = vpop.f32.mrf.mxu3 }
  0xc2   : > { %v503_v2 = vpop.f32.mrf.mxu0 }
  0xc3   : > { %v504_v27 = vadd.f32 %v1394_v17, %v503_v2  ;;  %v521_v2 = vadd.f32 %v1394_v17, %v520_v55 }
  0xc4   : > { %v559_v32 = vpop.f32.mrf.mxu1 }
  0xc5   : > { %v553_v30 = vadd.f32 %v552_v15, %v504_v27 }
  0xc7   : > { %v605_v33 = vmul.f32 0.2, %v553_v30  ;;  %vm589_vm5 = vcmp.gt.f32.partialorder %v553_v30, 0.0 }
  0xc8   : > { %v523_v61 = vpop.f32.mrf.mxu3 }
  0xc9   : > { %v621_v36 = vsel %vm589_vm5, %v553_v30, %v605_v33  ;;  %v524_v7 = vadd.f32 %v1394_v17, %v523_v61 }
  0xca   : > { %v505_v4 = vpop.f32.mrf.mxu0 }
  0xcb   : > { %v506_v34 = vadd.f32 %v1394_v17, %v505_v4 }
  0xcc   : > { %v562_v39 = vpop.f32.mrf.mxu1 }
  0xcd   : > { %v555_v35 = vadd.f32 %v554_v18, %v506_v34 }
  0xcf   : > { %v606_v37 = vmul.f32 0.2, %v555_v35  ;;  %vm590_vm6 = vcmp.gt.f32.partialorder %v555_v35, 0.0 }
  0xd0   : > { %v525_v5 = vpop.f32.mrf.mxu3 }
  0xd1   : > { %v622_v41 = vsel %vm590_vm6, %v555_v35, %v606_v37 }
  0xd2   : > { %v508_v9 = vpop.f32.mrf.mxu0 }
  0xd3   : > { %v509_v38 = vadd.f32 %v1394_v17, %v508_v9 }
  0xd4   : > { %v564_v44 = vpop.f32.mrf.mxu1 }
  0xd5   : > { %v558_v40 = vadd.f32 %v557_v24, %v509_v38 }
  0xd7   : > { %v607_v42 = vmul.f32 0.2, %v558_v40  ;;  %vm591_vm7 = vcmp.gt.f32.partialorder %v558_v40, 0.0 }
  0xd8   : > { %v528_v11 = vpop.f32.mrf.mxu3 }
  0xd9   : > { %v623_v46 = vsel %vm591_vm7, %v558_v40, %v607_v42 }
  0xda   : > { %v510_v13 = vpop.f32.mrf.mxu0 }
  0xdb   : > { %v511_v43 = vadd.f32 %v1394_v17, %v510_v13  ;;  %v526_v13 = vadd.f32 %v1394_v17, %v525_v5 }
  0xdc   : > { %v567_v50 = vpop.f32.mrf.mxu1 }
  0xdd   : > { %v560_v45 = vadd.f32 %v559_v32, %v511_v43  ;;  %v568_v62 = vadd.f32 %v567_v50, %v519_v60 }
  0xdf   : > { %v608_v48 = vmul.f32 0.2, %v560_v45  ;;  %vm592_vm8 = vcmp.gt.f32.partialorder %v560_v45, 0.0  ;;  %v611_v1 = vmul.f32 0.2, %v568_v62  ;;  %vm595_vm11 = vcmp.gt.f32.partialorder %v568_v62, 0.0 }
  0xe1   : > { %v624_v52 = vsel %vm592_vm8, %v560_v45, %v608_v48  ;;  %v627_v4 = vsel %vm595_vm11, %v568_v62, %v611_v1 }
  0xe2   : > { %v513_v14 = vpop.f32.mrf.mxu0 }
  0xe3   : > { %v514_v49 = vadd.f32 %v1394_v17, %v513_v14 }
  0xe4   : > { %v569_v58 = vpop.f32.mrf.mxu1 }
  0xe5   : > { %v563_v51 = vadd.f32 %v562_v39, %v514_v49  ;;  %v570_v3 = vadd.f32 %v569_v58, %v521_v2 }
  0xe7   : > { %v609_v53 = vmul.f32 0.2, %v563_v51  ;;  %vm593_vm9 = vcmp.gt.f32.partialorder %v563_v51, 0.0  ;;  %v612_v6 = vmul.f32 0.2, %v570_v3  ;;  %vm596_vm12 = vcmp.gt.f32.partialorder %v570_v3, 0.0 }
  0xe9   : > { %v625_v57 = vsel %vm593_vm9, %v563_v51, %v609_v53  ;;  %v628_v10 = vsel %vm596_vm12, %v570_v3, %v612_v6 }
  0xea   : > { %v515_v16 = vpop.f32.mrf.mxu0 }
  0xeb   : > { %v516_v54 = vadd.f32 %v1394_v17, %v515_v16 }
  0xec   : > { %v572_v0 = vpop.f32.mrf.mxu1 }
  0xed   : > { %v565_v56 = vadd.f32 %v564_v44, %v516_v54  ;;  %v573_v9 = vadd.f32 %v572_v0, %v524_v7 }
  0xef   : > { %v610_v59 = vmul.f32 0.2, %v565_v56  ;;  %vm594_vm10 = vcmp.gt.f32.partialorder %v565_v56, 0.0  ;;  %v613_v12 = vmul.f32 0.2, %v573_v9  ;;  %vm597_vm13 = vcmp.gt.f32.partialorder %v573_v9, 0.0 }
  0xf1   : > { %v626_v63 = vsel %vm594_vm10, %v565_v56, %v610_v59  ;;  %v629_v16 = vsel %vm597_vm13, %v573_v9, %v613_v12  ;;  %v1441_v56 = vld [vmem:[%s1520_s4] ss:$0 sm:$0xff] }
  0xf2   : > { %v547_v20 = vpop.f32.mrf.mxu0 }
  0xf3   : > { %v548_v21 = vadd.f32 %v547_v20, %v499_v19  ;;  %v529_v19 = vadd.f32 %v1394_v17, %v528_v11  ;;  %v530_v20 = vpop.f32.mrf.mxu3 }
  0xf4   : > { %v574_v8 = vpop.f32.mrf.mxu1 }
  0xf5   : > { %v603_v22 = vmul.f32 0.2, %v548_v21  ;;  %vm587_vm2 = vcmp.gt.f32.partialorder %v548_v21, 0.0  ;;  %v575_v15 = vadd.f32 %v574_v8, %v526_v13 }
  0xf7   : > { %v619_v23 = vsel %vm587_vm2, %v548_v21, %v603_v22  ;;  %v614_v18 = vmul.f32 0.2, %v575_v15  ;;  %vm598_vm14 = vcmp.gt.f32.partialorder %v575_v15, 0.0 }
  0xf8   : > { %1021 = vmatmul.msk.f32.vlgmr.msra.gmra.mxu2 %vm647_vm3, %v619_v23 }
  0xf9   : > { %v630_v22 = vsel %vm598_vm14, %v575_v15, %v614_v18 }
  0xfa   : > { %v549_v26 = vpop.f32.mrf.mxu0 }
  0xfb   : > { %v550_v28 = vadd.f32 %v549_v26, %v501_v25  ;;  %v531_v25 = vadd.f32 %v1394_v17, %v530_v20  ;;  %v533_v26 = vpop.f32.mrf.mxu3 }
  0xfc   : > { %v577_v14 = vpop.f32.mrf.mxu1 }
  0xfd   : > { %v604_v29 = vmul.f32 0.2, %v550_v28  ;;  %vm588_vm4 = vcmp.gt.f32.partialorder %v550_v28, 0.0  ;;  %v578_v21 = vadd.f32 %v577_v14, %v529_v19 }
  0xff   : > { %v620_v31 = vsel %vm588_vm4, %v550_v28, %v604_v29  ;;  %v615_v24 = vmul.f32 0.2, %v578_v21  ;;  %vm599_vm15 = vcmp.gt.f32.partialorder %v578_v21, 0.0  ;;  %vm812_vm4 = vcmask 130048  }
 0x100   : > { %1022 = vmatmul.msk.f32.gmra.mxu2 %vm647_vm3, %v620_v31  ;;  %v534_v31 = vadd.f32 %v1394_v17, %v533_v26 }
 0x101   : > { %v631_v28 = vsel %vm599_vm15, %v578_v21, %v615_v24 }
 0x103   : > { %v535_v34 = vpop.f32.mrf.mxu3 }
 0x104   : > { %v579_v23 = vpop.f32.mrf.mxu1 }
 0x105   : > { %v580_v27 = vadd.f32 %v579_v23, %v531_v25 }
 0x107   : > { %v616_v30 = vmul.f32 0.2, %v580_v27  ;;  %vm600_vm0 = vcmp.gt.f32.partialorder %v580_v27, 0.0 }
 0x108   : > { %1023 = vmatmul.msk.f32.gmra.mxu2 %vm647_vm3, %v621_v36  ;;  %v536_v36 = vadd.f32 %v1394_v17, %v535_v34 }
 0x109   : > { %v632_v33 = vsel %vm600_vm0, %v580_v27, %v616_v30 }
 0x10c   : > { %v582_v29 = vpop.f32.mrf.mxu1 }
 0x10d   : > { %v583_v32 = vadd.f32 %v582_v29, %v534_v31 }
 0x10f   : > { %v617_v35 = vmul.f32 0.2, %v583_v32  ;;  %vm601_vm1 = vcmp.gt.f32.partialorder %v583_v32, 0.0 }
 0x110   : > { %1024 = vmatmul.msk.f32.gmra.mxu2 %vm647_vm3, %v622_v41 }
 0x111   : > { %v633_v39 = vsel %vm601_vm1, %v583_v32, %v617_v35 }
 0x114   : > { %v584_v37 = vpop.f32.mrf.mxu1 }
 0x115   : > { %v585_v38 = vadd.f32 %v584_v37, %v536_v36 }
 0x117   : > { %v618_v40 = vmul.f32 0.2, %v585_v38  ;;  %vm602_vm2 = vcmp.gt.f32.partialorder %v585_v38, 0.0 }
 0x118   : > { %1025 = vmatmul.msk.f32.gmra.mxu2 %vm647_vm3, %v623_v46 }
 0x119   : > { %v634_v41 = vsel %vm602_vm2, %v585_v38, %v618_v40 }
 0x120   : > { %1026 = vmatmul.msk.f32.gmra.mxu2 %vm647_vm3, %v624_v52 }
 0x128   : > { %1027 = vmatmul.msk.f32.gmra.mxu2 %vm647_vm3, %v625_v57 }
 0x130   : > { %1028 = vmatmul.msk.f32.gmra.mxu2 %vm647_vm3, %v626_v63 }
 0x138   : > { %1029 = vmatmul.msk.f32.gmra.mxu2 %vm647_vm3, %v627_v4 }
 0x140   : > { %1030 = vmatmul.msk.f32.gmra.mxu2 %vm647_vm3, %v628_v10 }
 0x148   : > { %1031 = vmatmul.msk.f32.gmra.mxu2 %vm647_vm3, %v629_v16 }
 0x150   : > { %1032 = vmatmul.msk.f32.gmra.mxu2 %vm647_vm3, %v630_v22 }
 0x158   : > { %1033 = vmatmul.msk.f32.gmra.mxu2 %vm647_vm3, %v631_v28 }
 0x160   : > { %1034 = vmatmul.msk.f32.gmra.mxu2 %vm647_vm3, %v632_v33 }
 0x168   : > { %1035 = vmatmul.msk.f32.gmra.mxu2 %vm647_vm3, %v633_v39 }
 0x170   : > { %1036 = vmatmul.msk.f32.gmra.mxu2 %vm647_vm3, %v634_v41 }
 0x17b   : > { %v1428_v42 = vpop.f32.mrf.mxu2 }
 0x17c   : > { %v714_v37 = vadd.f32 %v1441_v56, %v1428_v42  ;;  %v811_v42 = vstv %s810_s23 }
 0x17e   : > { %v777_v40 = vmul.f32 0.2, %v714_v37 }
 0x183   : > { %v1430_v43 = vpop.f32.mrf.mxu2 }
 0x184   : > { %v717_v34 = vadd.f32 %v1441_v56, %v1430_v43 }
 0x186   : > { %v778_v38 = vmul.f32 0.2, %v717_v34  ;;  %vm762_vm2 = vcmp.gt.f32.partialorder %v717_v34, 0.0 }
 0x188   : > { %v794_v41 = vsel %vm762_vm2, %v717_v34, %v778_v38 }
 0x18b   : > { %v1432_v44 = vpop.f32.mrf.mxu2 }
 0x18c   : > { %v720_v31 = vadd.f32 %v1441_v56, %v1432_v44  ;;  %v809_v44 = vld [vmem:[%s1521_s5] sm:$0x1] }
 0x18e   : > { %v779_v35 = vmul.f32 0.2, %v720_v31  ;;  %vm763_vm1 = vcmp.gt.f32.partialorder %v720_v31, 0.0 }
 0x190   : > { %v795_v39 = vsel %vm763_vm1, %v720_v31, %v779_v35 }
 0x193   : > { %v1434_v45 = vpop.f32.mrf.mxu2 }
 0x194   : > { %v723_v28 = vadd.f32 %v1441_v56, %v1434_v45 }
 0x196   : > { %v780_v32 = vmul.f32 0.2, %v723_v28  ;;  %vm764_vm0 = vcmp.gt.f32.partialorder %v723_v28, 0.0 }
 0x198   : > { %v796_v36 = vsel %vm764_vm0, %v723_v28, %v780_v32 }
 0x19b   : > { %v1436_v17 = vpop.f32.mrf.mxu2 }
 0x19c   : > { %v726_v25 = vadd.f32 %v1441_v56, %v1436_v17 }
 0x19e   : > { %v781_v29 = vmul.f32 0.2, %v726_v25  ;;  %vm765_vm15 = vcmp.gt.f32.partialorder %v726_v25, 0.0 }
 0x1a0   : > { %v797_v33 = vsel %vm765_vm15, %v726_v25, %v781_v29 }
 0x1a3   : > { %v728_v46 = vpop.f32.mrf.mxu2 }
 0x1a4   : > { %v729_v22 = vadd.f32 %v1441_v56, %v728_v46 }
 0x1a6   : > { %v782_v26 = vmul.f32 0.2, %v729_v22  ;;  %vm766_vm14 = vcmp.gt.f32.partialorder %v729_v22, 0.0 }
 0x1a8   : > { %v798_v30 = vsel %vm766_vm14, %v729_v22, %v782_v26 }
 0x1ab   : > { %v731_v47 = vpop.f32.mrf.mxu2 }
 0x1ac   : > { %v732_v19 = vadd.f32 %v1441_v56, %v731_v47 }
 0x1ae   : > { %v783_v23 = vmul.f32 0.2, %v732_v19  ;;  %vm767_vm13 = vcmp.gt.f32.partialorder %v732_v19, 0.0 }
 0x1b0   : > { %v799_v27 = vsel %vm767_vm13, %v732_v19, %v783_v23 }
 0x1b3   : > { %v734_v48 = vpop.f32.mrf.mxu2 }
 0x1b4   : > { %v735_v15 = vadd.f32 %v1441_v56, %v734_v48 }
 0x1b6   : > { %v784_v20 = vmul.f32 0.2, %v735_v15  ;;  %vm768_vm12 = vcmp.gt.f32.partialorder %v735_v15, 0.0 }
 0x1b8   : > { %v800_v24 = vsel %vm768_vm12, %v735_v15, %v784_v20 }
 0x1bb   : > { %v737_v49 = vpop.f32.mrf.mxu2 }
 0x1bc   : > { %v738_v12 = vadd.f32 %v1441_v56, %v737_v49 }
 0x1be   : > { %v785_v16 = vmul.f32 0.2, %v738_v12  ;;  %vm769_vm11 = vcmp.gt.f32.partialorder %v738_v12, 0.0 }
 0x1c0   : > { %v801_v21 = vsel %vm769_vm11, %v738_v12, %v785_v16 }
 0x1c3   : > { %v740_v50 = vpop.f32.mrf.mxu2 }
 0x1c4   : > { %v741_v9 = vadd.f32 %v1441_v56, %v740_v50 }
 0x1c6   : > { %v786_v13 = vmul.f32 0.2, %v741_v9  ;;  %vm770_vm10 = vcmp.gt.f32.partialorder %v741_v9, 0.0 }
 0x1c8   : > { %v802_v18 = vsel %vm770_vm10, %v741_v9, %v786_v13 }
 0x1cb   : > { %v743_v51 = vpop.f32.mrf.mxu2 }
 0x1cc   : > { %v744_v6 = vadd.f32 %v1441_v56, %v743_v51 }
 0x1ce   : > { %v787_v10 = vmul.f32 0.2, %v744_v6  ;;  %vm771_vm9 = vcmp.gt.f32.partialorder %v744_v6, 0.0 }
 0x1d0   : > { %v803_v14 = vsel %vm771_vm9, %v744_v6, %v787_v10 }
 0x1d3   : > { %v746_v52 = vpop.f32.mrf.mxu2 }
 0x1d4   : > { %v747_v3 = vadd.f32 %v1441_v56, %v746_v52 }
 0x1d6   : > { %v788_v7 = vmul.f32 0.2, %v747_v3  ;;  %vm772_vm8 = vcmp.gt.f32.partialorder %v747_v3, 0.0 }
 0x1d8   : > { %v804_v11 = vsel %vm772_vm8, %v747_v3, %v788_v7 }
 0x1db   : > { %v749_v53 = vpop.f32.mrf.mxu2 }
 0x1dc   : > { %v750_v0 = vadd.f32 %v1441_v56, %v749_v53 }
 0x1de   : > { %v789_v4 = vmul.f32 0.2, %v750_v0  ;;  %vm773_vm7 = vcmp.gt.f32.partialorder %v750_v0, 0.0 }
 0x1e0   : > { %v805_v8 = vsel %vm773_vm7, %v750_v0, %v789_v4 }
 0x1e3   : > { %v752_v54 = vpop.f32.mrf.mxu2 }
 0x1e4   : > { %v753_v61 = vadd.f32 %v1441_v56, %v752_v54 }
 0x1e6   : > { %v790_v1 = vmul.f32 0.2, %v753_v61  ;;  %vm774_vm6 = vcmp.gt.f32.partialorder %v753_v61, 0.0 }
 0x1e8   : > { %v806_v5 = vsel %vm774_vm6, %v753_v61, %v790_v1 }
 0x1eb   : > { %v755_v55 = vpop.f32.mrf.mxu2 }
 0x1ec   : > { %v756_v58 = vadd.f32 %v1441_v56, %v755_v55 }
 0x1ee   : > { %v791_v62 = vmul.f32 0.2, %v756_v58  ;;  %vm775_vm5 = vcmp.gt.f32.partialorder %v756_v58, 0.0 }
 0x1f0   : > { %v807_v2 = vsel %vm775_vm5, %v756_v58, %v791_v62 }
 0x1f3   : > { %v758_v57 = vpop.f32.mrf.mxu2 }
 0x1f4   : > { %v759_v59 = vadd.f32 %v1441_v56, %v758_v57 }
 0x1f6   : > { %v792_v60 = vmul.f32 0.2, %v759_v59  ;;  %vm776_vm3 = vcmp.gt.f32.partialorder %v759_v59, 0.0 }
 0x1f8   : > { %v808_v63 = vsel %vm776_vm3, %v759_v59, %v792_v60  ;;  %vm761_vm3 = vcmp.gt.f32.partialorder %v714_v37, 0.0 }
 0x1f9   : > { %1037 = vmatpush.xpose.msk.msrb.mxu3 %vm812_vm4, %v808_v63  ;;  %v793_v43 = vsel %vm761_vm3, %v714_v37, %v777_v40 }
 0x1fd   : > { %1038 = vmatpush.xpose.msk.msrb.mxu3 %vm812_vm4, %v807_v2 }
 0x201   : > { %1039 = vmatpush.xpose.msk.msrb.mxu3 %vm812_vm4, %v806_v5 }
 0x205   : > { %1040 = vmatpush.xpose.msk.msrb.mxu3 %vm812_vm4, %v805_v8 }
 0x209   : > { %1041 = vmatpush.xpose.msk.msrb.mxu3 %vm812_vm4, %v804_v11 }
 0x20d   : > { %1042 = vmatpush.xpose.msk.msrb.mxu3 %vm812_vm4, %v803_v14 }
 0x211   : > { %1043 = vmatpush.xpose.msk.msrb.mxu3 %vm812_vm4, %v802_v18 }
 0x215   : > { %1044 = vmatpush.xpose.msk.msrb.mxu3 %vm812_vm4, %v801_v21 }
 0x219   : > { %1045 = vmatpush.xpose.msk.msrb.mxu3 %vm812_vm4, %v800_v24 }
 0x21d   : > { %1046 = vmatpush.xpose.msk.msrb.mxu3 %vm812_vm4, %v799_v27 }
 0x221   : > { %1047 = vmatpush.xpose.msk.msrb.mxu3 %vm812_vm4, %v798_v30 }
 0x225   : > { %1048 = vmatpush.xpose.msk.msrb.mxu3 %vm812_vm4, %v797_v33 }
 0x229   : > { %1049 = vmatpush.xpose.msk.msrb.mxu3 %vm812_vm4, %v796_v36 }
 0x22d   : > { %1050 = vmatpush.xpose.msk.msrb.mxu3 %vm812_vm4, %v795_v39 }
 0x231   : > { %1051 = vmatpush.xpose.msk.msrb.mxu3 %vm812_vm4, %v794_v41 }
 0x235   : > { %1052 = vmatpush.xpose.msk.msrb.mxu3 %vm812_vm4, %v793_v43 }
 0x238   : > { %1053 = vmatmul.msk.f32.vlgmr.msrb.gmra.mxu3 %vm812_vm4, %v809_v44 }
 0x2bb   : > { %v881_v45 = vpop.f32.mrf.mxu3 }
 0x2bc   : > { %v882_v17 = vadd.f32 %v881_v45, %v811_v42 }
 0x2be   : > { %v884_v46 = vsub.f32 0.0, %v882_v17 }
 0x2c0   : > { %v885_v47 = vmul.f32 1.442695, %v884_v46 }
 0x2c2   : > { %1123 = vpow2.f32 %v885_v47 }
 0x2c8   : > { %v1124_v48 = vpop.eup %1123 }
 0x2c9   : > { %v887_v49 = vadd.f32 1.0, %v1124_v48 }
 0x2cb   : > { %1125 = vrcp.f32 %v887_v49 }
 0x2d1   : > { %v1126_v50 = vpop.eup %1125 }
 0x2d2   : > { %889 = vst [vmem:[%s289_s9] sm:$0x1] %v1126_v50 }
 0x2d3   : > { %1154 = shalt.err (!%p1151_p3)
}
 0x2d4   : > { %1082 = dma.vmem_to_hbm [thread:$0]  (%p1272_p5), %s902_s10, 16, %s904_s14, %s891_s15  }
 0x2d5 PF: > { %p1088_p4 = scmp.ge.s32.totalorder %s1189_s29, 2  ;;  %s915_s23 = sand.u32 1, %s1177_s26  }
 0x2d6   : > { %s916_s24 = scalar_lea.sflag [#allocation4], %s915_s23 }
 0x2d7   : > { %p1085_p7 = pnand %p1088_p4, %p1276_p6 }
 0x2d9   : > { %p1086_p8 = pneg %p1085_p7 }
 0x2db   : > { %1172 = dma.done.wait (%p1086_p8), %s916_s24, 16  }
 0x2dc   : > { %1174 = vsyncadd (%p1086_p8), %s916_s24, 4294967280  ;;  %p18_p9 = scmp.ge.s32.totalorder %s1259_s8, 5   ;;  %s1526_s26 = smov %s1181_s27 }
 0x2dd   : > { %s1527_s27 = smov %s1185_s28  ;;  %s1528_s28 = smov %s1270_s11 }
 0x2de   : > { %s1529_s29 = smov %s1259_s8  ;;  %20 = sbr.rel (!%p18_p9) target bundleno = 5 (0x5), region = 83 }
 0x2e3   :  { %921 = vsyncpa [#allocation4], 1 }
 0x2e4   :  { %923 = vsyncpa [#allocation4 + $0x1], 1 }

</bundles_post_ra>
